<compile_context>
chip_gen: v6e
topology: v6e:2x2x1
jax: 0.10.0
libtpu: 0.0.40
codegen_flags: <defaults>
</compile_context>

<pallas_src>
import functools

import jax
import jax.numpy as jnp
from jax.experimental import pallas as pl
from jax.experimental.pallas import tpu as pltpu

# Streamed-matmul operand dtype: bf16 halves HBM/VMEM bytes for the big
# adjacency / item-embedding streams and doubles MXU throughput on v6e/v7x.
# All accumulation / normalization / transcendental math stays f32.
MATMUL_DTYPE = jnp.bfloat16
_EPS = 1e-12
_VMEM_LIMIT = 64 * 1024 * 1024


def _l2norm(x, axis=-1):
    ss = jnp.sum(x * x, axis=axis, keepdims=True)
    return x * jax.lax.rsqrt(ss + _EPS)          # rsqrt -> EUP slot (free-ish)


def _pick_tile(n, pref, granule):
    """Largest divisor of n that is a multiple of `granule` and <= pref; else n."""
    if n <= pref:
        return n
    t = (pref // granule) * granule
    while t >= granule:
        if n % t == 0:
            return t
        t -= granule
    return n


# ----------------------------------------------------------------------------
# Kernel 1a: row-tiled Linear (no bias): bf16 operands, f32 MXU acc, bf16 out.
# ----------------------------------------------------------------------------
def _xw_kernel(x_ref, w_ref, o_ref):
    o_ref[...] = jnp.dot(x_ref[...], w_ref[...],
                         preferred_element_type=jnp.float32).astype(o_ref.dtype)


def linear_nobias(x, w, *, tm=1024, out_dtype=MATMUL_DTYPE):
    n, d = x.shape
    x = x.astype(MATMUL_DTYPE)
    w = w.astype(MATMUL_DTYPE)
    tm = _pick_tile(n, tm, 8)
    return pl.pallas_call(
        _xw_kernel,
        grid=(n // tm,),
        in_specs=[pl.BlockSpec((tm, d), lambda i: (i, 0)),
                  pl.BlockSpec((d, d), lambda i: (0, 0))],
        out_specs=pl.BlockSpec((tm, d), lambda i: (i, 0)),
        out_shape=jax.ShapeDtypeStruct((n, d), out_dtype),
        compiler_params=pltpu.CompilerParams(
            dimension_semantics=("parallel",),
            vmem_limit_bytes=_VMEM_LIMIT),
    )(x, w)


# ----------------------------------------------------------------------------
# Kernel 1b: one ItemConv layer:  y = adj @ xw ;  acc_out = (acc_in + l2norm(y)) * s
#   grid = (N/tm rows "parallel", N/tk K-blocks "arbitrary"); f32 VMEM scratch
#   accumulator; adj & xw streamed in bf16; y (bf16) emitted only when needed.
# ----------------------------------------------------------------------------
def _adj_layer_kernel(*refs, emit_y, out_scale):
    if emit_y:
        acc_ref, adj_ref, xw_ref, y_ref, accout_ref, scr_ref = refs
    else:
        acc_ref, adj_ref, xw_ref, accout_ref, scr_ref = refs
        y_ref = None
    k = pl.program_id(1)

    @pl.when(k == 0)
    def _():
        scr_ref[...] = jnp.zeros_like(scr_ref)

    scr_ref[...] += jnp.dot(adj_ref[...], xw_ref[...],
                            preferred_element_type=jnp.float32)

    @pl.when(k == pl.num_programs(1) - 1)
    def _():
        y = scr_ref[...]
        if emit_y:
            y_ref[...] = y.astype(y_ref.dtype)       # unnormalized -> next layer
        res = acc_ref[...] + _l2norm(y)              # normalized -> running sum
        if out_scale != 1.0:
            res = res * out_scale                    # fold /(layers+1) into last layer
        accout_ref[...] = res


def adj_conv_layer(acc, adj_lo, xw_lo, *, tm=512, tk=512,
                   emit_y=True, out_scale=1.0):
    n, d = acc.shape
    tm = _pick_tile(n, tm, 8)
    tk = _pick_tile(n, tk, 128)

    if emit_y:
        out_specs = (pl.BlockSpec((tm, d), lambda i, k: (i, 0)),
                     pl.BlockSpec((tm, d), lambda i, k: (i, 0)))
        out_shape = (jax.ShapeDtypeStruct((n, d), MATMUL_DTYPE),
                     jax.ShapeDtypeStruct((n, d), jnp.float32))
    else:
        out_specs = pl.BlockSpec((tm, d), lambda i, k: (i, 0))
        out_shape = jax.ShapeDtypeStruct((n, d), jnp.float32)

    return pl.pallas_call(
        functools.partial(_adj_layer_kernel, emit_y=emit_y,
                          out_scale=float(out_scale)),
        grid=(n // tm, n // tk),
        in_specs=[pl.BlockSpec((tm, d), lambda i, k: (i, 0)),   # acc (resident)
                  pl.BlockSpec((tm, tk), lambda i, k: (i, k)),  # adj (bf16)
                  pl.BlockSpec((tk, d), lambda i, k: (k, 0))],  # xw  (bf16)
        out_specs=out_specs,
        out_shape=out_shape,
        scratch_shapes=[pltpu.VMEM((tm, d), jnp.float32)],
        compiler_params=pltpu.CompilerParams(
            dimension_semantics=("parallel", "arbitrary"),
            vmem_limit_bytes=_VMEM_LIMIT),
    )(acc, adj_lo, xw_lo)


def item_conv(adj, emb, w_stack, *, tm=512, tk=512):
    """ItemConv: out = (emb + sum_i l2norm(adj @ (x_i @ W_i))) / (layers+1)."""
    layers = w_stack.shape[0]
    if layers == 0:
        return emb
    adj_lo = adj.astype(MATMUL_DTYPE)   # cast the big streamed operand once
    inv = 1.0 / float(layers + 1)
    x = emb
    acc = emb                            # layer-0 term (NOT normalized)
    for i in range(layers):
        last = (i == layers - 1)
        xw = linear_nobias(x, w_stack[i], tm=tm)
        res = adj_conv_layer(acc, adj_lo, xw, tm=tm, tk=tk,
                             emit_y=not last,
                             out_scale=inv if last else 1.0)
        if last:
            acc = res
        else:
            x, acc = res
    return acc


# ----------------------------------------------------------------------------
# Kernel 2: generate_sess_emb attention (single-shot; everything fits VMEM).
# ----------------------------------------------------------------------------
def _sess_attn_kernel(seq_h_ref, pos_ref, slen_ref, mask_ref,
                      w1a_ref, w1b_ref, glu1w_ref, glu1b_ref, glu2w_ref,
                      w2row_ref, out_ref):
    B, L, D = seq_h_ref.shape
    seq_h = seq_h_ref[...]                                       # (B, L, D)
    hs = jnp.sum(seq_h, axis=1) / slen_ref[...]                  # (B, D)

    pos_part = jnp.dot(pos_ref[...], w1a_ref[...],
                       preferred_element_type=jnp.float32)       # (L, D)
    seq_part = jnp.dot(seq_h.reshape(B * L, D), w1b_ref[...],
                       preferred_element_type=jnp.float32).reshape(B, L, D)
    nh = jnp.tanh(seq_part + pos_part[None, :, :])               # (B, L, D)

    g1 = jnp.dot(nh.reshape(B * L, D), glu1w_ref[...],
                 preferred_element_type=jnp.float32).reshape(B, L, D)
    g1 = g1 + glu1b_ref[...][None, :, :]
    g2 = jnp.dot(hs, glu2w_ref[...],
                 preferred_element_type=jnp.float32)[:, None, :]
    nh = jax.nn.sigmoid(g1 + g2)

    # beta via VPU multiply + lane reduce (avoids a lane-1 MXU matmul).
    beta = jnp.sum(nh * w2row_ref[...][None, :, :], axis=-1, keepdims=True)
    beta = beta * mask_ref[...][:, :, None]
    out_ref[...] = jnp.sum(beta * seq_h, axis=1)                 # (B, D)


def sess_attention(seq_h, pos_emb, session_len, mask,
                   w1a, w1b, glu1_w, glu1_b, glu2_w, w2_row):
    B, L, D = seq_h.shape
    return pl.pallas_call(
        _sess_attn_kernel,
        out_shape=jax.ShapeDtypeStruct((B, D), jnp.float32),
        compiler_params=pltpu.CompilerParams(vmem_limit_bytes=_VMEM_LIMIT),
    )(seq_h, pos_emb, session_len, mask, w1a, w1b, glu1_w, glu1_b, glu2_w,
      w2_row)


# ----------------------------------------------------------------------------
# Kernel 3: normalized score matmul + cross-entropy, tiled over the item dim
#   with an online logsumexp; target logit picked via iota compare (no one-hot);
#   normalized/scaled session embedding cached once in bf16 VMEM scratch.
# ----------------------------------------------------------------------------
def _scores_kernel(sess_ref, item_ref, tar_ref, scores_ref, loss_ref,
                   s_scr, m_scr, l_scr, t_scr, *, w_k):
    j = pl.program_id(0)

    @pl.when(j == 0)
    def _():
        s_scr[...] = (w_k * _l2norm(sess_ref[...])).astype(s_scr.dtype)
        m_scr[...] = jnp.full_like(m_scr, -jnp.inf)
        l_scr[...] = jnp.zeros_like(l_scr)
        t_scr[...] = jnp.zeros_like(t_scr)

    item = _l2norm(item_ref[...].astype(jnp.float32)).astype(MATMUL_DTYPE)
    scores = jax.lax.dot_general(                                 # (B, tn)
        s_scr[...], item,
        dimension_numbers=(((1,), (1,)), ((), ())),
        preferred_element_type=jnp.float32)
    scores_ref[...] = scores

    tn = scores.shape[1]
    col = j * tn + jax.lax.broadcasted_iota(jnp.int32, scores.shape, 1)
    is_tar = col == tar_ref[...]                                  # (B, tn)
    t_scr[...] += jnp.sum(jnp.where(is_tar, scores, 0.0), axis=1, keepdims=True)

    m_new = jnp.maximum(m_scr[...], jnp.max(scores, axis=1, keepdims=True))
    l_scr[...] = (l_scr[...] * jnp.exp(m_scr[...] - m_new)
                  + jnp.sum(jnp.exp(scores - m_new), axis=1, keepdims=True))
    m_scr[...] = m_new

    @pl.when(j == pl.num_programs(0) - 1)
    def _():
        per_row = m_scr[...] + jnp.log(l_scr[...]) - t_scr[...]   # (B, 1)
        loss_ref[...] = jnp.broadcast_to(jnp.mean(per_row), (1, 1))


def scores_and_loss(sess_emb, item_emb, tar, w_k, *, tn=512):
    B, d = sess_emb.shape
    n = item_emb.shape[0]
    tn = _pick_tile(n, tn, 128)
    item_lo = item_emb.astype(MATMUL_DTYPE)      # halve streamed bytes
    tar2 = tar.reshape(B, 1).astype(jnp.int32)
    return pl.pallas_call(
        functools.partial(_scores_kernel, w_k=float(w_k)),
        grid=(n // tn,),
        in_specs=[pl.BlockSpec((B, d), lambda j: (0, 0)),
                  pl.BlockSpec((tn, d), lambda j: (j, 0)),
                  pl.BlockSpec((B, 1), lambda j: (0, 0))],
        out_specs=(pl.BlockSpec((B, tn), lambda j: (0, j)),
                   pl.BlockSpec((1, 1), lambda j: (0, 0))),
        out_shape=(jax.ShapeDtypeStruct((B, n), jnp.float32),
                   jax.ShapeDtypeStruct((1, 1), jnp.float32)),
        scratch_shapes=[pltpu.VMEM((B, d), MATMUL_DTYPE),
                        pltpu.VMEM((B, 1), jnp.float32),
                        pltpu.VMEM((B, 1), jnp.float32),
                        pltpu.VMEM((B, 1), jnp.float32)],
        compiler_params=pltpu.CompilerParams(
            dimension_semantics=("arbitrary",),
            vmem_limit_bytes=_VMEM_LIMIT),
    )(sess_emb, item_lo, tar2)


# ----------------------------------------------------------------------------
# COTREC wrapper (eval path of COTREC.forward)
# ----------------------------------------------------------------------------
def _pad2(a, rows, cols):
    out = jnp.zeros((rows, cols), a.dtype)
    return out.at[:a.shape[0], :a.shape[1]].set(a)


class COTRECPallas:
    def __init__(self, n_node, layers, beta, lam, emb_size, pos_len, key,
                 tile_m=512, tile_k=512, tile_n=512):
        self.n_node = n_node
        self.layers = layers
        self.beta = beta
        self.lam = lam
        self.emb_size = emb_size
        self.w_k = 10.0
        self.tm, self.tk, self.tn = tile_m, tile_k, tile_n

        Dl = emb_size
        Dp = ((Dl + 127) // 128) * 128      # lane-pad embedding dim to 128*
        self.emb_pad = Dp

        stdv = 1.0 / (Dl ** 0.5)
        ks = jax.random.split(key, 10)
        u = lambda k, shape: jax.random.uniform(k, shape, jnp.float32, -stdv, stdv)

        emb = u(ks[0], (n_node, Dl))
        pos = u(ks[1], (pos_len, Dl))
        w_item = u(ks[2], (layers, Dl, Dl))
        w_1 = u(ks[3], (2 * Dl, Dl))
        w_2 = u(ks[4], (Dl, 1))
        glu1_w = u(ks[5], (Dl, Dl))
        glu1_b = u(ks[6], (1, Dl))
        glu2_w = u(ks[7], (Dl, Dl))

        # Zero-padded parameters (padding columns/rows contribute exactly 0).
        self.embedding = _pad2(emb, n_node, Dp)
        self.pos_embedding = _pad2(pos, pos_len, Dp)
        self.w_item = jnp.stack([_pad2(w_item[i], Dp, Dp) for i in range(layers)])
        self.w1a = _pad2(w_1[:Dl], Dp, Dp)      # pos-embedding half of w_1
        self.w1b = _pad2(w_1[Dl:], Dp, Dp)      # seq-embedding half of w_1
        self.w2_row = _pad2(w_2.T, 1, Dp)       # (1, Dp) row for VPU reduce
        self.glu1_w = _pad2(glu1_w, Dp, Dp)
        self.glu1_b = _pad2(glu1_b, 1, Dp)
        self.glu2_w = _pad2(glu2_w, Dp, Dp)

    def forward(self, adjacency, session_item, session_len,
                reversed_sess_item, mask, tar):
        # --- ItemConv graph convolution (tiled Pallas matmuls) ---
        item_emb_i = item_conv(adjacency, self.embedding, self.w_item,
                               tm=self.tm, tk=self.tk)

        # --- generate_sess_emb: masked gather (glue) + attention (Pallas) ---
        ids = reversed_sess_item.astype(jnp.int32)
        gather_idx = jnp.clip(ids - 1, 0, self.n_node - 1)
        seq_h = item_emb_i[gather_idx] * (ids > 0)[..., None].astype(jnp.float32)
        L = ids.shape[1]
        pos_emb = self.pos_embedding[:L]
        sess_emb_i = sess_attention(
            seq_h, pos_emb, session_len, mask.astype(jnp.float32),
            self.w1a, self.w1b, self.glu1_w, self.glu1_b, self.glu2_w,
            self.w2_row)

        # --- normalized score matmul + cross-entropy (tiled, online LSE) ---
        scores_item, loss_item = scores_and_loss(
            sess_emb_i, item_emb_i, tar, self.w_k, tn=self.tn)

        con_loss = jnp.float32(0.0)   # eval path
        loss_diff = jnp.float32(0.0)  # eval path
        return (self.beta * con_loss, loss_item[0, 0], scores_item,
                loss_diff * self.lam)


if __name__ == "__main__":
    # Small, module-consistent shapes; tile sizes chosen so grids are > 1.
    n_node, emb_size, layers = 256, 32, 2
    batch, seq_len, pos_len = 8, 16, 200
    beta, lam = 0.005, 0.005

    key = jax.random.PRNGKey(0)
    k_param, k_adj, k_sess, k_tar = jax.random.split(key, 4)

    model = COTRECPallas(n_node, layers, beta, lam, emb_size, pos_len, k_param,
                         tile_m=128, tile_k=128, tile_n=128)

    # Dense row-normalized adjacency (stand-in for the scipy.coo sparse matrix).
    adj_raw = (jax.random.uniform(k_adj, (n_node, n_node)) > 0.9).astype(jnp.float32)
    adj_raw = adj_raw + jnp.eye(n_node, dtype=jnp.float32)
    adjacency = adj_raw / jnp.sum(adj_raw, axis=1, keepdims=True)

    # Session data: item ids in [0 .. n_node], 0 = padding.
    reversed_sess_item = jax.random.randint(
        k_sess, (batch, seq_len), 0, n_node + 1).astype(jnp.int32)
    session_item = reversed_sess_item[:, ::-1]
    mask = (reversed_sess_item != 0).astype(jnp.float32)
    session_len = jnp.maximum(jnp.sum(mask, axis=1, keepdims=True), 1.0)
    tar = jax.random.randint(k_tar, (batch,), 0, n_node).astype(jnp.int32)

    con_loss, loss_item, scores_item, loss_diff = model.forward(
        adjacency, session_item, session_len, reversed_sess_item, mask, tar)
    jax.block_until_ready((con_loss, loss_item, scores_item, loss_diff))

    assert scores_item.shape == (batch, n_node)
    assert bool(jnp.isfinite(loss_item))
    print("KERNEL_OK")
</pallas_src>

<mosaic_0001>
module attributes {stable_mosaic.version = 11 : i64} {
  func.func @_xw_kernel(%arg0: i32, %arg1: memref<128x128xbf16, #tpu.memory_space<vmem>>, %arg2: memref<128x128xbf16, #tpu.memory_space<vmem>>, %arg3: memref<128x128xbf16, #tpu.memory_space<vmem>>) attributes {dimension_semantics = [#tpu.dimension_semantics<parallel>], iteration_bounds = array<i64: 2>, scalar_prefetch = 0 : i64, scratch_operands = 0 : i64, tpu.core_type = #tpu.core_type<tc>, window_params = [{transform_indices = @transform_0, window_bounds = array<i64: 128, 128>}, {pipeline_mode = #tpu.pipeline_mode<synchronous>, transform_indices = @transform_1, window_bounds = array<i64: 128, 128>}, {transform_indices = @transform_2, window_bounds = array<i64: 128, 128>}]} {
    %c0 = arith.constant 0 : index
    %c0_0 = arith.constant 0 : index
    %0 = vector.load %arg1[%c0, %c0_0] : memref<128x128xbf16, #tpu.memory_space<vmem>>, vector<128x128xbf16>
    %c0_1 = arith.constant 0 : index
    %c0_2 = arith.constant 0 : index
    %1 = vector.load %arg2[%c0_1, %c0_2] : memref<128x128xbf16, #tpu.memory_space<vmem>>, vector<128x128xbf16>
    %cst = arith.constant dense<0.000000e+00> : vector<128x128xf32>
    %2 = tpu.matmul %0, %1, %cst {dimension_numbers = #tpu.dot_dimension_numbers<[1], [0], [0], [1], [0, 0, 1, 1], [], []>} : vector<128x128xbf16>, vector<128x128xbf16>, vector<128x128xf32> -> vector<128x128xf32>
    %3 = arith.truncf %2 : vector<128x128xf32> to vector<128x128xbf16>
    %c0_3 = arith.constant 0 : index
    %c0_4 = arith.constant 0 : index
    %4 = vector.load %arg3[%c0_3, %c0_4] : memref<128x128xbf16, #tpu.memory_space<vmem>>, vector<128x128xbf16>
    tpu.vector_store %arg3[%c0_3, %c0_4], %3 {strides = array<i32>} : memref<128x128xbf16, #tpu.memory_space<vmem>>, vector<128x128xbf16>,
    return
  }
  func.func @transform_0(%arg0: i32) -> (i32, i32) {
    %c0_i32 = arith.constant 0 : i32
    %c0_i32_0 = arith.constant 0 : i32
    return %arg0, %c0_i32 : i32, i32
  }
  func.func @transform_1(%arg0: i32) -> (i32, i32) {
    %c0_i32 = arith.constant 0 : i32
    %c0_i32_0 = arith.constant 0 : i32
    %c0_i32_1 = arith.constant 0 : i32
    return %c0_i32, %c0_i32_0 : i32, i32
  }
  func.func @transform_2(%arg0: i32) -> (i32, i32) {
    %c0_i32 = arith.constant 0 : i32
    %c0_i32_0 = arith.constant 0 : i32
    return %arg0, %c0_i32 : i32, i32
  }
}

</mosaic_0001>

<bundles_post_ra>
// kernel: tpu_custom_call.1
= control target key start
LH: loop header
LB: loop body
LE: loop exit
PB: predicated region body
PF: predicated region fallthrough
CT: control target
= control target key end

     0   :  { %7 = vsyncpa [#allocation3], 0  ;;  %s1179_s0 = inlined_call_operand.hbm [shape: bf16[256,128], index: 0, kind: input, shape index: {}]   ;;  %s1180_s1 = inlined_call_operand.hbm [shape: bf16[128,128], index: 1, kind: input, shape index: {}]   ;;  %s1181_s2 = inlined_call_operand.hbm [shape: bf16[256,128], index: 2, kind: output, shape index: {}]  }
   0x1   :  { %9 = vsyncpa [#allocation3 + $0x1], 0 }
   0x2   :  { %10 = vsyncpa [#allocation6], 0 }
   0x3   :  { %11 = vsyncpa [#allocation4], 0 }
   0x4   :  { %13 = vsyncpa [#allocation4 + $0x1], 0  ;;  %s982_s9 = smov 0   ;;  %s984_s10 = smov 0  }
   0x5   :  { %s986_s11 = smov 0   ;;  %s988_s12 = smov 0  }
   0x6 LB: > { %s1003_s13 = sadd.s32 4294967295, %s958_s12   ;;  %s582_s14 = sadd.s32 4294967294, %s958_s12   ;;  %s958_s12 = sphi %s988_s12, %s1203_s12   ;;  %s954_s11 = sphi %s986_s11, %s1202_s11   ;;  %s950_s10 = sphi %s984_s10, %s1201_s10   ;;  %s946_s9 = sphi %s982_s9, %s1200_s9  }
   0x7   : > { %p39_p0 = scmp.ne.s32.totalorder %s950_s10, %s946_s9  ;;  %p1182_p1 = scmp.eq.s32.totalorder %s1003_s13, 0 }
   0x8   : > { %p90_p3 = scmp.eq.s32.totalorder %s582_s14, 1  ;;  %p583_p5 = scmp.ge.s32.totalorder %s958_s12, 1 }
   0x9   : > { %p1012_p4 = por %p1182_p1, %p39_p0  ;;  %p97_p7 = scmp.lt.s32.totalorder %s958_s12, 3 }
   0xa   : > { %p1017_p6 = por %p90_p3, %p39_p0  ;;  %s960_s18 = smov [#allocation5]  }
   0xb   : > { %s1186_s15 = scalar_select %p1012_p4, 1, 0 }
   0xc   : > { %s1187_s16 = scalar_select %p1017_p6, 1, 0 }
   0xd   : > { %p1022_p8 = pnand %p583_p5, %p97_p7  ;;  %s109_s19 = sshll.u32 %s960_s18, 4  ;;  %s110_s19 = int_to_ptr.vmem [resolvable:$true] %s109_s19 }
   0xe   : > { %s1036_s21 = sadd.s32 1, %s958_s12   ;;  %s26_s22 = sadd.s32 1, %s954_s11 }
   0xf   : > { %s1188_s17 = scalar_select %p1022_p8, 1, 0 }
  0x10   : > { %p767_p9 = pneg %p1022_p8  ;;  %s23_s23 = ssub.s32 %s958_s12, %s1036_s21 }
  0x11   : > { %s847_s24 = scalar_lea.vmem %s110_s19, 1024  ;;  %p855_p5 = scmp.lt.s32.totalorder %s110_s19, %s110_s19 }
  0x12   : > { %p1031_p11 = pnand %p767_p9, %p1182_p1  ;;  %p848_p13 = scmp.ne.s32.totalorder %s110_s19, %s847_s24 }
  0x13   : > { %p856_p7 = scmp.lt.s32.totalorder %s847_s24, %s847_s24 }
  0x14   : > { %p838_p12 = pneg %p1031_p11 }
  0x15   : > { %p857_p10 = por %p856_p7, %p855_p5 }
  0x16   : > { %p850_p0 = pnand %p848_p13, %p838_p12 }
  0x18   : > { %p851_p3 = pneg %p850_p0 }
  0x1a   : > { %p858_p2 = pnand %p857_p10, %p851_p3 }
  0x1c   : > { %861 = shalt.err (!%p858_p2)
}
  0x1d   : > { %s961_s25 = smov 64   ;;  %s962_s26 = smov 4  }
  0x1e   : > { %770 = dma.hbm_to_vmem [thread:$0]  (!%p1031_p11), %s1180_s1, 1024, %s110_s19, [#allocation6], %s961_s25, %s961_s25, %s962_s26  }
  0x1f   : > { %p24_p2 = scmp.eq.s32.totalorder %s23_s23, 0  ;;  %p33_p9 = scmp.ne.s32.totalorder %s954_s11, %s950_s10 }
  0x20   : > { %p34_p10 = scmp.eq.s32.totalorder %s958_s12, 0  ;;  %p780_p12 = scmp.lt.s32.totalorder %s958_s12, 2 }
  0x21   : > { %s1056_s29 = scalar_select %p24_p2, %s954_s11, %s26_s22  }
  0x22   : > { %p35_p13 = por %p34_p10, %p33_p9  ;;  %p1190_p0 = scmp.eq.s32.totalorder %s1003_s13, 1 }
  0x23   : > { %s123_s3 = sand.u32 1, %s954_s11   ;;  %s630_s4 = sshll.u32 %s958_s12, 10 }
  0x24   : > { %p1060_p3 = por %p1190_p0, %p33_p9  ;;  %s586_s5 = sshll.u32 %s123_s3, 6 }
  0x25   : > { %s1069_s8 = scalar_lea.hbm %s1179_s0, %s630_s4  ;;  %s127_s14 = scalar_lea.vmem [#allocation2], %s586_s5 }
  0x26   : > { %s1191_s30 = scalar_select %p1060_p3, 1, 0 }
  0x27   : > { %s134_s18 = sshll.u32 %s127_s14, 4  ;;  %p1071_p11 = pnand %p780_p12, %p35_p13  ;;  %s1075_s18 = int_to_ptr.vmem [resolvable:$true] %s134_s18 }
  0x28   : > { %s1077_s20 = scalar_lea.sflag [#allocation3], %s123_s3  ;;  %s862_s22 = scalar_lea.hbm %s1069_s8, 1024 }
  0x29   : > { %p863_p5 = scmp.ne.s32.totalorder %s1069_s8, %s862_s22  ;;  %p864_p7 = pneg %p1071_p11 }
  0x2a   : > { %s867_s27 = scalar_lea.hbm %s1179_s0, 2048  ;;  %p868_p10 = scmp.lt.s32.totalorder %s1069_s8, %s1179_s0 }
  0x2b   : > { %p865_p2 = pnand %p864_p7, %p863_p5  ;;  %p869_p12 = scmp.lt.s32.totalorder %s867_s27, %s862_s22 }
  0x2d   : > { %p866_p9 = pneg %p865_p2  ;;  %p870_p13 = por %p869_p12, %p868_p10 }
  0x2f   : > { %p871_p0 = pnand %p870_p13, %p866_p9 }
  0x31   : > { %874 = shalt.err (!%p871_p0)
}
  0x32   : > { %s875_s3 = scalar_lea.vmem %s1075_s18, 1024  ;;  %s963_s5 = smov [#allocation2]  }
  0x33   : > { %p876_p1 = scmp.ne.s32.totalorder %s1075_s18, %s875_s3  ;;  %s880_s6 = sshll.u32 %s963_s5, 4  ;;  %s881_s6 = int_to_ptr.vmem [resolvable:$false] %s880_s6 }
  0x34   : > { %s882_s7 = scalar_lea.vmem %s881_s6, 2048  ;;  %p883_p2 = scmp.lt.s32.totalorder %s1075_s18, %s881_s6 }
  0x35   : > { %p878_p6 = pnand %p876_p1, %p864_p7  ;;  %p884_p3 = scmp.lt.s32.totalorder %s882_s7, %s875_s3 }
  0x37   : > { %p879_p5 = pneg %p878_p6  ;;  %p885_p4 = por %p884_p3, %p883_p2 }
  0x39   : > { %p886_p8 = pnand %p885_p4, %p879_p5 }
  0x3b   : > { %889 = shalt.err (!%p886_p8)
}
  0x3c   : > { %774 = dma.hbm_to_vmem [thread:$0]  (!%p1071_p11), %s1069_s8, 1024, %s1075_s18, %s1077_s20, %s961_s25, %s961_s25, %s962_s26  }
  0x3d   : > { %p1193_p1 = scmp.ne.s32.totalorder %s1188_s17, 0 }
  0x3e   : > { %s1104_s14 = sand.u32 (!%p1193_p1), 1, %s950_s10   ;;  %p1194_p4 = scmp.ne.s32.totalorder (!%p1193_p1), %s1186_s15, 0 }
  0x3f   : > { %146 = sbr.rel (%p1193_p1) target bundleno = 328 (0x148), region = 28  ;;  %s590_s22 = sshll.u32 (!%p1193_p1), %s1104_s14, 6 }
  0x40   : > { %s149_s23 = scalar_lea.sflag (!%p1193_p1), [#allocation3], %s1104_s14  ;;  %s1110_s19 = scalar_lea.vmem (!%p1193_p1), [#allocation2], %s590_s22 }
  0x44   : > { %933 = dma.done.wait (%p1194_p4), %s149_s23, 1024  }
  0x45   : > { %935 = vsyncadd (%p1194_p4), %s149_s23, 4294966272  ;;  %p1195_p6 = scmp.eq.s32.totalorder %s1003_s13, 0 }
  0x47   : > { %937 = dma.done.wait (%p1195_p6), [#allocation6], 1024   ;;  %p1196_p8 = pmov %p1195_p6 }
  0x48   : > { %v820_v0 = vld [vmem:[#allocation5 + $0x38] sm:$0xff]   ;;  %v821_v1 = vld [vmem:[#allocation5 + $0x30] sm:$0xff]   ;;  %v822_v2 = vld [vmem:[#allocation5 + $0x28] sm:$0xff]   ;;  %s176_s15 = scalar_lea.vmem [#allocation7], %s590_s22  ;;  %s647_s25 = sshll.u32 %s1003_s13, 10 }
  0x49   : > { %939 = vsyncadd (%p1196_p8), [#allocation6], 4294966272  ;;  %711 = vmatprep.subr.bf16.mxu0 %v820_v0  ;;  %743 = vmatprep.subr.bf16.mxu1 %v820_v0  ;;  %v823_v3 = vld [vmem:[#allocation5 + $0x20] sm:$0xff]   ;;  %v824_v6 = vld [vmem:[#allocation5 + $0x18] sm:$0xff]   ;;  %s499_s17 = sshll.u32 %s176_s15, 4  ;;  %s1136_s18 = scalar_lea.hbm %s1181_s2, %s647_s25  ;;  %s1131_s17 = int_to_ptr.vmem [resolvable:$true] %s499_s17 }
  0x4a   : > { %712 = vmatpush3.bf16.msra.mxu0 %v820_v0  ;;  %751 = vmatpush3.bf16.msra.mxu1 %v820_v0  ;;  %v828_v4 = vld [vmem:[%s1110_s19] sm:$0xff]   ;;  %v825_v7 = vld [vmem:[#allocation5 + $0x10] sm:$0xff]   ;;  %v826_v8 = vld [vmem:[#allocation5 + $0x8] sm:$0xff]   ;;  %s486_s13 = scalar_lea.sflag [#allocation4], %s1104_s14  ;;  %s890_s20 = scalar_lea.vmem %s1131_s17, 1024 }
  0x4b   : > { %713 = vmatprep.subr.bf16.mxu0 %v821_v1  ;;  %744 = vmatprep.subr.bf16.mxu1 %v821_v1  ;;  %v829_v5 = vld [vmem:[%s1110_s19 + $0x20] sm:$0xff]   ;;  %v830_v10 = vld [vmem:[%s1110_s19 + $0x8] sm:$0xff]   ;;  %v832_v12 = vld [vmem:[%s1110_s19 + $0x10] sm:$0xff]   ;;  %p891_p3 = scmp.ne.s32.totalorder %s1131_s17, %s890_s20  ;;  %p1197_p11 = scmp.ne.s32.totalorder %s1191_s30, 0 }
  0x4c   : > { %727 = vmatprep.mubr.bf16.mxu0 %v828_v4  ;;  %735 = vmatprep.mubr.bf16.mxu1 %v829_v5  ;;  %v827_v9 = vld [vmem:[#allocation5] sm:$0xff]   ;;  %v831_v11 = vld [vmem:[%s1110_s19 + $0x28] sm:$0xff]   ;;  %v833_v13 = vld [vmem:[%s1110_s19 + $0x30] sm:$0xff]   ;;  %s964_s24 = smov [#allocation7]  }
  0x4d   : > { %v834_v14 = vld [vmem:[%s1110_s19 + $0x18] sm:$0xff]   ;;  %p892_p7 = pnand %p891_p3, %p1197_p11  ;;  %s894_s27 = sshll.u32 %s964_s24, 4  ;;  %s895_s27 = int_to_ptr.vmem [resolvable:$false] %s894_s27 }
  0x4e   : > { %714 = vmatpush3.bf16.msra.mxu0 %v821_v1  ;;  %752 = vmatpush3.bf16.msra.mxu1 %v821_v1  ;;  %v835_v15 = vld [vmem:[%s1110_s19 + $0x38] sm:$0xff]   ;;  %s896_s28 = scalar_lea.vmem %s895_s27, 2048  ;;  %p897_p10 = scmp.lt.s32.totalorder %s1131_s17, %s895_s27 }
  0x4f   : > { %715 = vmatprep.subr.bf16.mxu0 %v822_v2  ;;  %745 = vmatprep.subr.bf16.mxu1 %v822_v2  ;;  %p893_p9 = pneg %p892_p7  ;;  %p898_p12 = scmp.lt.s32.totalorder %s896_s28, %s890_s20 }
  0x51   : > { %p899_p13 = por %p898_p12, %p897_p10 }
  0x52   : > { %716 = vmatpush3.bf16.msra.mxu0 %v822_v2  ;;  %753 = vmatpush3.bf16.msra.mxu1 %v822_v2 }
  0x53   : > { %717 = vmatprep.subr.bf16.mxu0 %v823_v3  ;;  %746 = vmatprep.subr.bf16.mxu1 %v823_v3  ;;  %p900_p0 = pnand %p899_p13, %p893_p9 }
  0x56   : > { %718 = vmatpush3.bf16.msra.mxu0 %v823_v3  ;;  %754 = vmatpush3.bf16.msra.mxu1 %v823_v3 }
  0x57   : > { %719 = vmatprep.subr.bf16.mxu0 %v824_v6  ;;  %747 = vmatprep.subr.bf16.mxu1 %v824_v6 }
  0x5a   : > { %720 = vmatpush3.bf16.msra.mxu0 %v824_v6  ;;  %755 = vmatpush3.bf16.msra.mxu1 %v824_v6 }
  0x5b   : > { %721 = vmatprep.subr.bf16.mxu0 %v825_v7  ;;  %748 = vmatprep.subr.bf16.mxu1 %v825_v7 }
  0x5e   : > { %722 = vmatpush3.bf16.msra.mxu0 %v825_v7  ;;  %756 = vmatpush3.bf16.msra.mxu1 %v825_v7 }
  0x5f   : > { %723 = vmatprep.subr.bf16.mxu0 %v826_v8  ;;  %749 = vmatprep.subr.bf16.mxu1 %v826_v8 }
  0x62   : > { %724 = vmatpush3.bf16.msra.mxu0 %v826_v8  ;;  %757 = vmatpush3.bf16.msra.mxu1 %v826_v8 }
  0x63   : > { %725 = vmatprep.subr.bf16.mxu0 %v827_v9  ;;  %750 = vmatprep.subr.bf16.mxu1 %v827_v9 }
  0x66   : > { %726 = vmatpush3.bf16.msra.mxu0 %v827_v9  ;;  %758 = vmatpush3.bf16.msra.mxu1 %v827_v9 }
  0x69   : > { %728 = vmatmul.mubr.bf16.vlgmr.msra.gmra.mxu0 %v830_v10  ;;  %736 = vmatmul.mubr.bf16.vlgmr.msra.gmra.mxu1 %v831_v11 }
  0x6a   : > { %731 = vmatprep.mubr.bf16.mxu0 %v832_v12  ;;  %739 = vmatprep.mubr.bf16.mxu1 %v833_v13 }
  0x71   : > { %732 = vmatmul.mubr.bf16.gmra.mxu0 %v834_v14  ;;  %740 = vmatmul.mubr.bf16.gmra.mxu1 %v835_v15 }
 0x129   : > { %v729_v16 = vpop.f32.mrf.mxu0  ;;  %v737_v17 = vpop.f32.mrf.mxu1 }
 0x12b   : > { %v342_v18 = vpop.f32.mrf.mxu0  ;;  %v374_v19 = vpop.f32.mrf.mxu1 }
 0x12d   : > { %v730_v20 = vpop.f32.mrf.mxu0  ;;  %v738_v21 = vpop.f32.mrf.mxu1 }
 0x12e   : > { %v656_v22 = vpack.c.bf16 %v730_v20, %v729_v16  ;;  %v676_v23 = vpack.c.bf16 %v738_v21, %v737_v17 }
 0x12f   : > { %v345_v24 = vpop.f32.mrf.mxu0  ;;  %v377_v25 = vpop.f32.mrf.mxu1 }
 0x130   : > { %688 = vst [vmem:[%s176_s15 + $0x8] sm:$0xff] %v656_v22   ;;  %692 = vst [vmem:[%s176_s15 + $0x28] sm:$0xff] %v676_v23   ;;  %v651_v26 = vpack.c.bf16 %v345_v24, %v342_v18  ;;  %v671_v27 = vpack.c.bf16 %v377_v25, %v374_v19 }
 0x131   : > { %v733_v28 = vpop.f32.mrf.mxu0  ;;  %v741_v29 = vpop.f32.mrf.mxu1 }
 0x132   : > { %652 = vst [vmem:[%s176_s15] sm:$0xff] %v651_v26   ;;  %691 = vst [vmem:[%s176_s15 + $0x20] sm:$0xff] %v671_v27  }
 0x133   : > { %v358_v30 = vpop.f32.mrf.mxu0  ;;  %v390_v31 = vpop.f32.mrf.mxu1 }
 0x135   : > { %v734_v32 = vpop.f32.mrf.mxu0  ;;  %v742_v33 = vpop.f32.mrf.mxu1 }
 0x136   : > { %v666_v34 = vpack.c.bf16 %v734_v32, %v733_v28  ;;  %v686_v35 = vpack.c.bf16 %v742_v33, %v741_v29 }
 0x137   : > { %v361_v36 = vpop.f32.mrf.mxu0  ;;  %v393_v37 = vpop.f32.mrf.mxu1 }
 0x138   : > { %690 = vst [vmem:[%s176_s15 + $0x18] sm:$0xff] %v666_v34   ;;  %694 = vst [vmem:[%s176_s15 + $0x38] sm:$0xff] %v686_v35   ;;  %v661_v38 = vpack.c.bf16 %v361_v36, %v358_v30  ;;  %v681_v39 = vpack.c.bf16 %v393_v37, %v390_v31 }
 0x13a   : > { %689 = vst [vmem:[%s176_s15 + $0x10] sm:$0xff] %v661_v38   ;;  %693 = vst [vmem:[%s176_s15 + $0x30] sm:$0xff] %v681_v39  }
 0x13b   : > { %903 = shalt.err (!%p900_p0)
}
 0x13c   : > { %s904_s4 = scalar_lea.hbm %s1136_s18, 1024  ;;  %s908_s6 = scalar_lea.hbm %s1181_s2, 2048 }
 0x13d   : > { %p905_p5 = scmp.ne.s32.totalorder %s1136_s18, %s904_s4  ;;  %p909_p4 = scmp.lt.s32.totalorder %s1136_s18, %s1181_s2 }
 0x13e   : > { %p910_p6 = scmp.lt.s32.totalorder %s908_s6, %s904_s4 }
 0x13f   : > { %p906_p2 = pnand %p905_p5, %p1197_p11 }
 0x140   : > { %p911_p8 = por %p910_p6, %p909_p4 }
 0x141   : > { %p907_p1 = pneg %p906_p2 }
 0x143   : > { %p912_p3 = pnand %p911_p8, %p907_p1 }
 0x145   : > { %915 = shalt.err (!%p912_p3)
}
 0x146   : > { %s965_s23 = smov 64   ;;  %s966_s19 = smov 4  }
 0x147   : > { %765 = dma.vmem_to_hbm [thread:$0]  (%p1197_p11), %s1131_s17, 1024, %s1136_s18, %s486_s13, %s965_s23, %s965_s23, %s966_s19  }
 0x148 PF: > { %s514_s15 = sand.u32 1, %s946_s9   ;;  %p1198_p7 = scmp.ne.s32.totalorder %s1187_s16, 0 }
 0x149   : > { %p1199_p9 = scmp.ge.s32.totalorder %s958_s12, 2  ;;  %s515_s25 = scalar_lea.sflag [#allocation4], %s514_s15 }
 0x14b   : > { %p776_p10 = pnand %p1199_p9, %p1198_p7 }
 0x14d   : > { %p777_p12 = pneg %p776_p10 }
 0x14f   : > { %941 = dma.done.wait (%p777_p12), %s515_s25, 1024  }
 0x150   : > { %943 = vsyncadd (%p777_p12), %s515_s25, 4294966272  ;;  %p16_p13 = scmp.ge.s32.totalorder %s1036_s21, 4   ;;  %s1200_s9 = smov %s950_s10 }
 0x151   : > { %s1201_s10 = smov %s954_s11  ;;  %s1202_s11 = smov %s1056_s29 }
 0x152   : > { %s1203_s12 = smov %s1036_s21  ;;  %18 = sbr.rel (!%p16_p13) target bundleno = 6 (0x6), region = 77 }
 0x157   :  { %520 = vsyncpa [#allocation3], 1 }
 0x158   :  { %522 = vsyncpa [#allocation3 + $0x1], 1 }
 0x159   :  { %523 = vsyncpa [#allocation6], 1 }
 0x15a   :  { %524 = vsyncpa [#allocation4], 1 }
 0x15b   :  { %526 = vsyncpa [#allocation4 + $0x1], 1 }

</bundles_post_ra>
